<compile_context>
chip_gen: v5e
topology: v5e:2x2
jax: 0.10.0
libtpu: 0.0.40
codegen_flags: <defaults>
</compile_context>

<pallas_src>
import functools

import jax
import jax.numpy as jnp
from jax.experimental import pallas as pl
from jax.experimental.pallas import tpu as pltpu


def fused_multi_embedding_kernel(ids_ref, tbl_ref, out_ref, *, row_offsets):
    """ids_ref: (TB, N) int32; tbl_ref: (V_total, E) block-diag; out_ref: (TB, E).

    multi_hot[t, v] = sum_i (v == ids[t, i] + row_offsets[i]); one MXU matmul with
    the block-diagonal table then yields the concatenated embeddings directly.
    """
    ids = ids_ref[...]                                   # (TB, N) int32
    tbl = tbl_ref[...]                                   # (V_total, E)
    tb = ids.shape[0]
    v_total = tbl.shape[0]

    iota = jax.lax.broadcasted_iota(jnp.int32, (tb, v_total), 1)
    multi_hot = jnp.zeros((tb, v_total), tbl.dtype)
    for i, off in enumerate(row_offsets):                # N is small & static
        multi_hot = multi_hot + (iota == (ids[:, i:i + 1] + off)).astype(tbl.dtype)

    out = jax.lax.dot_general(
        multi_hot, tbl,
        dimension_numbers=(((1,), (0,)), ((), ())),
        preferred_element_type=jnp.float32,
        precision=jax.lax.Precision.HIGHEST)             # exact f32 gather
    out_ref[...] = out.astype(out_ref.dtype)


def multi_embedding_forward(inputs, tables, *, token_tile=1024):
    """inputs: list of (B, T) int32 index arrays; tables: list of (V_i, D_i) arrays.

    Returns (B, T, sum(D_i)) == torch.cat([emb_i(inputs_i)], dim=2).
    """
    num_streams = len(inputs)
    assert num_streams == len(tables)
    B, T = inputs[0].shape
    vocab_sizes = [int(t.shape[0]) for t in tables]
    embed_dims = [int(t.shape[1]) for t in tables]
    V_total = sum(vocab_sizes)
    E = sum(embed_dims)
    out_dtype = tables[0].dtype
    itemsize = jnp.dtype(out_dtype).itemsize

    # --- wrapper-side layout plumbing (tiny tensors) ---------------------------
    # Stack the N index streams into one (tokens, N) array -> one ids DMA per step.
    ids = jnp.stack([ip.reshape(-1).astype(jnp.int32) for ip in inputs], axis=-1)
    total_tokens = B * T

    # Block-diagonal combined table: table i at row off_i, column col_i.
    row_offsets = []
    acc = 0
    for v in vocab_sizes:
        row_offsets.append(acc)
        acc += v
    row_offsets = tuple(row_offsets)
    combined = jnp.zeros((V_total, E), out_dtype)
    col = 0
    for off, tbl, d in zip(row_offsets, tables, embed_dims):
        combined = combined.at[off:off + tbl.shape[0], col:col + d].set(
            tbl.astype(out_dtype))
        col += d

    # --- token tiling: big tiles, but guarantee >= 2 grid steps when possible ---
    if total_tokens >= 16:
        tb = max(8, min(token_tile, (total_tokens // 2 // 8) * 8))
    elif total_tokens >= 8:
        tb = 8
    else:
        tb = total_tokens                                 # block == full dim
    grid = (pl.cdiv(total_tokens, tb),)

    # --- VMEM budget: ~2x actual double-buffered blocks, capped under v7x 64MiB --
    blk_bytes = (2 * tb * num_streams * 4                 # ids blocks (x2 buffers)
                 + 2 * tb * E * itemsize                  # out blocks (x2 buffers)
                 + 2 * V_total * E * itemsize             # table (worst case x2)
                 + tb * V_total * 4)                      # multi-hot intermediate
    vmem_limit = int(min(48 * 1024 * 1024, max(4 * 1024 * 1024, 2 * blk_bytes)))

    kernel = functools.partial(fused_multi_embedding_kernel, row_offsets=row_offsets)

    def _call(single_buffer_table):
        tbl_kwargs = {}
        if single_buffer_table:
            # Constant table: no need to double-buffer it in VMEM.
            tbl_kwargs = dict(pipeline_mode=pl.Buffered(1))
        grid_spec = pltpu.PrefetchScalarGridSpec(
            num_scalar_prefetch=0,
            grid=grid,
            in_specs=[
                pl.BlockSpec((tb, num_streams), lambda i: (i, 0)),
                pl.BlockSpec((V_total, E), lambda i: (0, 0), **tbl_kwargs),
            ],
            out_specs=pl.BlockSpec((tb, E), lambda i: (i, 0)),
        )
        return pl.pallas_call(
            kernel,
            out_shape=jax.ShapeDtypeStruct((total_tokens, E), out_dtype),
            grid_spec=grid_spec,
            compiler_params=pltpu.CompilerParams(
                dimension_semantics=("parallel",),        # megacore sharding on v7x
                vmem_limit_bytes=vmem_limit,
            ),
        )(ids, combined)

    try:
        out_flat = jax.block_until_ready(_call(True))
    except Exception:
        # Fallback if this JAX/Mosaic build does not accept Buffered(1) here.
        out_flat = _call(False)

    return out_flat.reshape(B, T, E)


def init_tables(key, vocab_sizes, embed_dims, padding_idxs):
    tables = []
    keys = jax.random.split(key, len(vocab_sizes))
    for k, v, d, p in zip(keys, vocab_sizes, embed_dims, padding_idxs):
        tbl = jax.random.normal(k, (v, d), jnp.float32)
        tbl = tbl.at[p].set(0.0)                          # padding_idx / pad_init()
        tables.append(tbl)
    return tables


if __name__ == "__main__":
    # Small config consistent with the module: 3 index streams.
    vocab_sizes = [20, 12, 12]
    embed_dims = [8, 4, 4]           # total E = 16
    padding_idxs = [1, 1, 1]
    B, T = 2, 8

    key = jax.random.PRNGKey(0)
    k_tbl, k1, k2, k3 = jax.random.split(key, 4)
    tables = init_tables(k_tbl, vocab_sizes, embed_dims, padding_idxs)

    inputs = [
        jax.random.randint(k1, (B, T), 0, vocab_sizes[0], jnp.int32),
        jax.random.randint(k2, (B, T), 0, vocab_sizes[1], jnp.int32),
        jax.random.randint(k3, (B, T), 0, vocab_sizes[2], jnp.int32),
    ]

    out = multi_embedding_forward(inputs, tables)
    out = jax.block_until_ready(out)

    # Reference: torch.cat([emb(ip) for ...], dim=2) == concat of row gathers.
    ref = jnp.concatenate(
        [jnp.take(tbl, ids, axis=0) for tbl, ids in zip(tables, inputs)], axis=-1)

    assert out.shape == (B, T, sum(embed_dims))
    assert bool(jnp.all(jnp.isfinite(out)))
    assert bool(jnp.allclose(out, ref, atol=1e-6))
    print("KERNEL_OK")
</pallas_src>

<mosaic_0001>
module attributes {stable_mosaic.version = 11 : i64} {
  func.func @fused_multi_embedding_kernel(%arg0: i32, %arg1: memref<8x3xi32, #tpu.memory_space<vmem>>, %arg2: memref<44x16xf32, #tpu.memory_space<vmem>>, %arg3: memref<8x16xf32, #tpu.memory_space<vmem>>) attributes {dimension_semantics = [#tpu.dimension_semantics<parallel>], iteration_bounds = array<i64: 2>, scalar_prefetch = 0 : i64, scratch_operands = 0 : i64, tpu.core_type = #tpu.core_type<tc>, window_params = [{transform_indices = @transform_0, window_bounds = array<i64: 8, 3>}, {pipeline_mode = #tpu.pipeline_mode<synchronous>, transform_indices = @transform_1, window_bounds = array<i64: 44, 16>}, {transform_indices = @transform_2, window_bounds = array<i64: 8, 16>}]} {
    %c0 = arith.constant 0 : index
    %c0_0 = arith.constant 0 : index
    %0 = vector.load %arg1[%c0, %c0_0] : memref<8x3xi32, #tpu.memory_space<vmem>>, vector<8x3xi32>
    %c0_1 = arith.constant 0 : index
    %c0_2 = arith.constant 0 : index
    %1 = vector.load %arg2[%c0_1, %c0_2] : memref<44x16xf32, #tpu.memory_space<vmem>>, vector<44x16xf32>
    %2 = tpu.iota {dimensions = array<i32: 1>} : vector<8x44xi32>
    %cst = arith.constant 0.000000e+00 : f32
    %3 = vector.broadcast %cst : f32 to vector<8x44xf32>
    %4 = vector.extract_strided_slice %0 {offsets = [0, 0], sizes = [8, 1], strides = [1, 1]} : vector<8x3xi32> to vector<8x1xi32>
    %c0_i32 = arith.constant 0 : i32
    %5 = vector.broadcast %c0_i32 : i32 to vector<8x1xi32>
    %6 = arith.addi %4, %5 : vector<8x1xi32>
    %7 = vector.broadcast %6 : vector<8x1xi32> to vector<8x44xi32>
    %8 = arith.cmpi eq, %2, %7 : vector<8x44xi32>
    %9 = arith.extui %8 : vector<8x44xi1> to vector<8x44xi32>
    %10 = arith.sitofp %9 : vector<8x44xi32> to vector<8x44xf32>
    %11 = arith.addf %3, %10 : vector<8x44xf32>
    %12 = vector.extract_strided_slice %0 {offsets = [0, 1], sizes = [8, 1], strides = [1, 1]} : vector<8x3xi32> to vector<8x1xi32>
    %c20_i32 = arith.constant 20 : i32
    %13 = vector.broadcast %c20_i32 : i32 to vector<8x1xi32>
    %14 = arith.addi %12, %13 : vector<8x1xi32>
    %15 = vector.broadcast %14 : vector<8x1xi32> to vector<8x44xi32>
    %16 = arith.cmpi eq, %2, %15 : vector<8x44xi32>
    %17 = arith.extui %16 : vector<8x44xi1> to vector<8x44xi32>
    %18 = arith.sitofp %17 : vector<8x44xi32> to vector<8x44xf32>
    %19 = arith.addf %11, %18 : vector<8x44xf32>
    %20 = vector.extract_strided_slice %0 {offsets = [0, 2], sizes = [8, 1], strides = [1, 1]} : vector<8x3xi32> to vector<8x1xi32>
    %c32_i32 = arith.constant 32 : i32
    %21 = vector.broadcast %c32_i32 : i32 to vector<8x1xi32>
    %22 = arith.addi %20, %21 : vector<8x1xi32>
    %23 = vector.broadcast %22 : vector<8x1xi32> to vector<8x44xi32>
    %24 = arith.cmpi eq, %2, %23 : vector<8x44xi32>
    %25 = arith.extui %24 : vector<8x44xi1> to vector<8x44xi32>
    %26 = arith.sitofp %25 : vector<8x44xi32> to vector<8x44xf32>
    %27 = arith.addf %19, %26 : vector<8x44xf32>
    %cst_3 = arith.constant dense<0.000000e+00> : vector<8x16xf32>
    %28 = tpu.matmul %27, %1, %cst_3 {dimension_numbers = #tpu.dot_dimension_numbers<[1], [0], [0], [1], [0, 0, 1, 1], [], []>, precision = #tpu.contract_precision<fp32>} : vector<8x44xf32>, vector<44x16xf32>, vector<8x16xf32> -> vector<8x16xf32>
    %c0_4 = arith.constant 0 : index
    %c0_5 = arith.constant 0 : index
    %29 = vector.load %arg3[%c0_4, %c0_5] : memref<8x16xf32, #tpu.memory_space<vmem>>, vector<8x16xf32>
    tpu.vector_store %arg3[%c0_4, %c0_5], %28 {strides = array<i32>} : memref<8x16xf32, #tpu.memory_space<vmem>>, vector<8x16xf32>,
    return
  }
  func.func @transform_0(%arg0: i32) -> (i32, i32) {
    %c0_i32 = arith.constant 0 : i32
    %c0_i32_0 = arith.constant 0 : i32
    return %arg0, %c0_i32 : i32, i32
  }
  func.func @transform_1(%arg0: i32) -> (i32, i32) {
    %c0_i32 = arith.constant 0 : i32
    %c0_i32_0 = arith.constant 0 : i32
    %c0_i32_1 = arith.constant 0 : i32
    return %c0_i32, %c0_i32_0 : i32, i32
  }
  func.func @transform_2(%arg0: i32) -> (i32, i32) {
    %c0_i32 = arith.constant 0 : i32
    %c0_i32_0 = arith.constant 0 : i32
    return %arg0, %c0_i32 : i32, i32
  }
}

module attributes {stable_mosaic.version = 11 : i64} {
  func.func @fused_multi_embedding_kernel(%arg0: i32, %arg1: memref<8x3xi32, #tpu.memory_space<vmem>>, %arg2: memref<44x16xf32, #tpu.memory_space<vmem>>, %arg3: memref<8x16xf32, #tpu.memory_space<vmem>>) attributes {dimension_semantics = [#tpu.dimension_semantics<parallel>], iteration_bounds = array<i64: 2>, scalar_prefetch = 0 : i64, scratch_operands = 0 : i64, tpu.core_type = #tpu.core_type<tc>, window_params = [{transform_indices = @transform_0, window_bounds = array<i64: 8, 3>}, {pipeline_mode = #tpu.pipeline_mode<synchronous>, transform_indices = @transform_1, window_bounds = array<i64: 44, 16>}, {transform_indices = @transform_2, window_bounds = array<i64: 8, 16>}]} {
    %c0 = arith.constant 0 : index
    %c0_0 = arith.constant 0 : index
    %0 = vector.load %arg1[%c0, %c0_0] : memref<8x3xi32, #tpu.memory_space<vmem>>, vector<8x3xi32>
    %c0_1 = arith.constant 0 : index
    %c0_2 = arith.constant 0 : index
    %1 = vector.load %arg2[%c0_1, %c0_2] : memref<44x16xf32, #tpu.memory_space<vmem>>, vector<44x16xf32>
    %2 = tpu.iota {dimensions = array<i32: 1>} : vector<8x44xi32>
    %cst = arith.constant 0.000000e+00 : f32
    %3 = vector.broadcast %cst : f32 to vector<8x44xf32>
    %4 = vector.extract_strided_slice %0 {offsets = [0, 0], sizes = [8, 1], strides = [1, 1]} : vector<8x3xi32> to vector<8x1xi32>
    %c0_i32 = arith.constant 0 : i32
    %5 = vector.broadcast %c0_i32 : i32 to vector<8x1xi32>
    %6 = arith.addi %4, %5 : vector<8x1xi32>
    %7 = vector.broadcast %6 : vector<8x1xi32> to vector<8x44xi32>
    %8 = arith.cmpi eq, %2, %7 : vector<8x44xi32>
    %9 = arith.extui %8 : vector<8x44xi1> to vector<8x44xi32>
    %10 = arith.sitofp %9 : vector<8x44xi32> to vector<8x44xf32>
    %11 = arith.addf %3, %10 : vector<8x44xf32>
    %12 = vector.extract_strided_slice %0 {offsets = [0, 1], sizes = [8, 1], strides = [1, 1]} : vector<8x3xi32> to vector<8x1xi32>
    %c20_i32 = arith.constant 20 : i32
    %13 = vector.broadcast %c20_i32 : i32 to vector<8x1xi32>
    %14 = arith.addi %12, %13 : vector<8x1xi32>
    %15 = vector.broadcast %14 : vector<8x1xi32> to vector<8x44xi32>
    %16 = arith.cmpi eq, %2, %15 : vector<8x44xi32>
    %17 = arith.extui %16 : vector<8x44xi1> to vector<8x44xi32>
    %18 = arith.sitofp %17 : vector<8x44xi32> to vector<8x44xf32>
    %19 = arith.addf %11, %18 : vector<8x44xf32>
    %20 = vector.extract_strided_slice %0 {offsets = [0, 2], sizes = [8, 1], strides = [1, 1]} : vector<8x3xi32> to vector<8x1xi32>
    %c32_i32 = arith.constant 32 : i32
    %21 = vector.broadcast %c32_i32 : i32 to vector<8x1xi32>
    %22 = arith.addi %20, %21 : vector<8x1xi32>
    %23 = vector.broadcast %22 : vector<8x1xi32> to vector<8x44xi32>
    %24 = arith.cmpi eq, %2, %23 : vector<8x44xi32>
    %25 = arith.extui %24 : vector<8x44xi1> to vector<8x44xi32>
    %26 = arith.sitofp %25 : vector<8x44xi32> to vector<8x44xf32>
    %27 = arith.addf %19, %26 : vector<8x44xf32>
    %cst_3 = arith.constant dense<0.000000e+00> : vector<8x16xf32>
    %28 = tpu.matmul %27, %1, %cst_3 {dimension_numbers = #tpu.dot_dimension_numbers<[1], [0], [0], [1], [0, 0, 1, 1], [], []>, precision = #tpu.contract_precision<fp32>} : vector<8x44xf32>, vector<44x16xf32>, vector<8x16xf32> -> vector<8x16xf32>
    %c0_4 = arith.constant 0 : index
    %c0_5 = arith.constant 0 : index
    %29 = vector.load %arg3[%c0_4, %c0_5] : memref<8x16xf32, #tpu.memory_space<vmem>>, vector<8x16xf32>
    tpu.vector_store %arg3[%c0_4, %c0_5], %28 {strides = array<i32>} : memref<8x16xf32, #tpu.memory_space<vmem>>, vector<8x16xf32>,
    return
  }
  func.func @transform_0(%arg0: i32) -> (i32, i32) {
    %c0_i32 = arith.constant 0 : i32
    %c0_i32_0 = arith.constant 0 : i32
    return %arg0, %c0_i32 : i32, i32
  }
  func.func @transform_1(%arg0: i32) -> (i32, i32) {
    %c0_i32 = arith.constant 0 : i32
    %c0_i32_0 = arith.constant 0 : i32
    %c0_i32_1 = arith.constant 0 : i32
    return %c0_i32, %c0_i32_0 : i32, i32
  }
  func.func @transform_2(%arg0: i32) -> (i32, i32) {
    %c0_i32 = arith.constant 0 : i32
    %c0_i32_0 = arith.constant 0 : i32
    return %arg0, %c0_i32 : i32, i32
  }
}

</mosaic_0001>

<bundles_post_ra>
// kernel: tpu_custom_call.1
= control target key start
LH: loop header
LB: loop body
LE: loop exit
PB: predicated region body
PF: predicated region fallthrough
CT: control target
= control target key end

     0   :  { %7 = vsyncpa [#allocation3], 0  ;;  %s713_s0 = inlined_call_operand.vmem [shape: s32[16,3], index: 0, kind: input, shape index: {}]   ;;  %s714_s1 = inlined_call_operand.vmem [shape: f32[44,16], index: 1, kind: input, shape index: {}]   ;;  %s715_s2 = inlined_call_operand.hbm [shape: f32[16,16], index: 2, kind: output, shape index: {}]  }
   0x1   :  { %9 = vsyncpa [#allocation3 + $0x1], 0  ;;  %s610_s9 = smov 0   ;;  %s612_s10 = smov 0  }
   0x2   :  { %s614_s11 = smov 0   ;;  %s616_s12 = smov 0  }
   0x3 LB: > { %s631_s13 = sadd.s32 4294967295, %s589_s12   ;;  %s467_s14 = sadd.s32 4294967294, %s589_s12   ;;  %s589_s12 = sphi %s616_s12, %s721_s12   ;;  %s585_s11 = sphi %s614_s11, %s720_s11   ;;  %s581_s10 = sphi %s612_s10, %s719_s10   ;;  %s577_s9 = sphi %s610_s9, %s718_s9  }
   0x4   : > { %s635_s15 = sadd.s32 1, %s589_s12   ;;  %s69_s16 = sadd.s32 1, %s585_s11 }
   0x5   : > { %s66_s17 = ssub.s32 %s589_s12, %s635_s15  ;;  %p79_p0 = scmp.ne.s32.totalorder %s585_s11, %s581_s10 }
   0x6   : > { %p67_p1 = scmp.eq.s32.totalorder %s66_s17, 0  ;;  %p80_p2 = scmp.eq.s32.totalorder %s631_s13, 1 }
   0x7   : > { %p85_p3 = scmp.ne.s32.totalorder %s581_s10, %s577_s9  ;;  %p86_p4 = scmp.eq.s32.totalorder %s467_s14, 1 }
   0x8   : > { %s646_s18 = scalar_select %p67_p1, %s585_s11, %s69_s16  }
   0x9   : > { %p648_p5 = por %p80_p2, %p79_p0  ;;  %p652_p6 = por %p86_p4, %p85_p3 }
   0xa   : > { %p470_p7 = scmp.ge.s32.totalorder %s589_s12, 1  ;;  %p114_p8 = scmp.lt.s32.totalorder %s589_s12, 3 }
   0xc   : > { %p115_p9 = pnand %p470_p7, %p114_p8 }
   0xd   : > { %p135_p10 = scmp.lt.s32.totalorder (!%p115_p9), %s631_s13, 1  ;;  %s132_s16 = sand.u32 (!%p115_p9), 1, %s581_s10  }
   0xe   : > { %118 = sbr.rel (%p115_p9) target bundleno = 306 (0x132), region = 28  ;;  %s471_s17 = sshll.u32 (!%p115_p9), %s132_s16, 3 }
   0xf   : > { %s547_s4 = scalar_lea.hbm (!%p115_p9), %s715_s2, 16 }
  0x13   : > { %v591_v0 = vmov 0   ;;  %v592_v1 = vmov 2   ;;  %s136_s21 = scalar_select %p135_p10, %s631_s13, 1  ;;  %v593_v5 = vmov 1   ;;  %v145_v6 = vld [vmem:[%s714_s1 + $0x28] sm:$0xf]  ;;  %v146_v43 = vlaneseq }
  0x14   : > { %523 = vset.pattern.permute.xlu0 %v591_v0  ;;  %525 = vset.pattern.permute.xlu1 %v592_v1  ;;  %vm175_vm0 = vcmask 1043456   ;;  %v144_v9 = vld [vmem:[%s714_s1 + $0x20] sm:$0xff]  ;;  %v143_v12 = vld [vmem:[%s714_s1 + $0x18] sm:$0xff]  ;;  %v142_v16 = vld [vmem:[%s714_s1 + $0x10] sm:$0xff]  ;;  %v594_v48 = vmov 0.0   ;;  %vm171_vm4 = vcmask 359424  }
  0x15   : > { %s472_s22 = sshll.u32 %s136_s21, 3  ;;  %v177_v7 = vsel %vm175_vm0, %v145_v6, 0  ;;  %v191_v11 = vand.u32 4294901760, %v144_v9  ;;  %v193_v15 = vand.u32 4294901760, %v143_v12  ;;  %v195_v20 = vand.u32 4294901760, %v142_v16  ;;  %v141_v21 = vld [vmem:[%s714_s1 + $0x8] sm:$0xff] }
  0x16   : > { %s138_s25 = scalar_lea.vmem %s713_s0, %s472_s22  ;;  %v189_v8 = vand.u32 4294901760, %v177_v7  ;;  %v197_v26 = vand.u32 4294901760, %v141_v21  ;;  %v140_v27 = vld [vmem:[%s714_s1] sm:$0xff]  ;;  %v147_v45 = vand.u32 127, %v146_v43  ;;  %s477_s21 = sshll.u32 %s631_s13, 3  ;;  %vm390_vm5 = vcmask 130048  }
  0x17   : > { %v139_v2 = vld [vmem:[%s138_s25] sm:$0xff]  ;;  %v227_v14 = vsub.f32 %v144_v9, %v191_v11  ;;  %v233_v19 = vsub.f32 %v143_v12, %v193_v15  ;;  %v239_v25 = vsub.f32 %v142_v16, %v195_v20  ;;  %v199_v31 = vand.u32 4294901760, %v140_v27  ;;  %s403_s24 = scalar_lea.hbm %s715_s2, %s477_s21  ;;  %s134_s25 = scalar_lea.vmem [#allocation2], %s471_s17 }
  0x18   : > { %149 = vperm.xlu0 %523, %v139_v2   ;;  %v163_v3 = vadd.s32 32, %v139_v2  ;;  %v155_v4 = vadd.s32 20, %v139_v2  ;;  %v221_v10 = vsub.f32 %v177_v7, %v189_v8  ;;  %306 = vmatpush.msra.mxu3 %v189_v8  ;;  %v245_v32 = vsub.f32 %v141_v21, %v197_v26  ;;  %s405_s26 = sshll.u32 %s134_s25, 4  ;;  %s407_s27 = sshll.u32 %s403_s24, 4  ;;  %s406_s26 = int_to_ptr.vmem [resolvable:$true] %s405_s26  ;;  %s408_s27 = int_to_ptr.hbm [resolvable:$true] %s407_s27 }
  0x19   : > { %190 = vmatpush.msra.mxu0 %v189_v8  ;;  %v228_v18 = vand.u32 4294901760, %v227_v14  ;;  %v234_v24 = vand.u32 4294901760, %v233_v19  ;;  %v240_v30 = vand.u32 4294901760, %v239_v25  ;;  %v251_v35 = vsub.f32 %v140_v27, %v199_v31  ;;  %s393_s13 = scalar_lea.sflag [#allocation3], %s132_s16  ;;  %s541_s28 = sshra.s32 %s408_s27, 4  ;;  %s542_s28 = int_to_ptr.hbm [resolvable:$true] %s541_s28 }
  0x1a   : > { %165 = vperm.xlu1 %525, %v163_v3   ;;  %v222_v13 = vand.u32 4294901760, %v221_v10  ;;  %273 = vmatpush.msra.mxu2 %v221_v10  ;;  %v246_v36 = vand.u32 4294901760, %v245_v32  ;;  %s543_s29 = scalar_lea.hbm %s542_s28, 8  ;;  %p548_p0 = scmp.lt.s32.totalorder %s542_s28, %s715_s2 }
  0x1b   : > { %308 = vmatpush.msra.mxu3 %v191_v11  ;;  %192 = vmatpush.msra.mxu0 %v191_v11  ;;  %v229_v23 = vsub.f32 %v227_v14, %v228_v18  ;;  %v235_v29 = vsub.f32 %v233_v19, %v234_v24  ;;  %v241_v34 = vsub.f32 %v239_v25, %v240_v30  ;;  %v252_v38 = vand.u32 4294901760, %v251_v35  ;;  %p544_p11 = scmp.ne.s32.totalorder %s542_s28, %s543_s29  ;;  %p549_p1 = scmp.lt.s32.totalorder %s547_s4, %s543_s29 }
  0x1c   : > { %v223_v17 = vsub.f32 %v221_v10, %v222_v13  ;;  %276 = vmatpush.msra.mxu2 %v227_v14  ;;  %v247_v39 = vsub.f32 %v245_v32, %v246_v36 }
  0x1d   : > { %310 = vmatpush.msra.mxu3 %v193_v15  ;;  %194 = vmatpush.msra.mxu0 %v193_v15  ;;  %v230_v28 = vand.u32 4294901760, %v229_v23  ;;  %v236_v33 = vand.u32 4294901760, %v235_v29  ;;  %v242_v37 = vand.u32 4294901760, %v241_v34  ;;  %v253_v40 = vsub.f32 %v251_v35, %v252_v38  ;;  %p545_p12 = pnand %p544_p11, %p648_p5  ;;  %p550_p2 = por %p549_p1, %p548_p0 }
  0x1e   : > { %v224_v22 = vand.u32 4294901760, %v223_v17  ;;  %279 = vmatpush.msra.mxu2 %v233_v19  ;;  %v248_v41 = vand.u32 4294901760, %v247_v39 }
  0x1f   : > { %312 = vmatpush.msra.mxu3 %v195_v20  ;;  %196 = vmatpush.msra.mxu0 %v195_v20  ;;  %v254_v42 = vand.u32 4294901760, %v253_v40  ;;  %p546_p13 = pneg %p545_p12 }
  0x20   : > { %524 = vset.pattern.permute.xlu0 %v593_v5  ;;  %225 = vmatpush.msra.mxu1 %v224_v22 }
  0x21   : > { %157 = vperm.xlu0 %524, %v155_v4   ;;  %282 = vmatpush.msra.mxu2 %v239_v25  ;;  %p551_p3 = pnand %p550_p2, %p546_p13 }
  0x22   : > { %314 = vmatpush.msra.mxu3 %v197_v26  ;;  %198 = vmatpush.msra.mxu0 %v197_v26 }
  0x23   : > { %231 = vmatpush.msra.mxu1 %v230_v28  ;;  %285 = vmatpush.msra.mxu2 %v245_v32 }
  0x24   : > { %316 = vmatpush.msra.mxu3 %v199_v31  ;;  %200 = vmatpush.msra.mxu0 %v199_v31 }
  0x25   : > { %237 = vmatpush.msra.mxu1 %v236_v33  ;;  %288 = vmatpush.msra.mxu2 %v251_v35 }
  0x26   : > { %337 = vmatpush.msrb.mxu0 %v222_v13 }
  0x27   : > { %243 = vmatpush.msra.mxu1 %v242_v37 }
  0x28   : > { %341 = vmatpush.msrb.mxu0 %v228_v18 }
  0x29   : > { %526 = vset.pattern.permute.xlu0 %v592_v1  ;;  %249 = vmatpush.msra.mxu1 %v248_v41 }
  0x2a   : > { %345 = vmatpush.msrb.mxu0 %v234_v24 }
  0x2b   : > { %255 = vmatpush.msra.mxu1 %v254_v42 }
  0x2c   : > { %349 = vmatpush.msrb.mxu0 %v240_v30 }
  0x2d   : > { %374 = vmatpush.msrb.mxu1 %v189_v8 }
  0x2e   : > { %353 = vmatpush.msrb.mxu0 %v246_v36 }
  0x2f   : > { %376 = vmatpush.msrb.mxu1 %v191_v11 }
  0x30   : > { %357 = vmatpush.msrb.mxu0 %v252_v38 }
  0x31   : > { %378 = vmatpush.msrb.mxu1 %v193_v15 }
  0x33   : > { %380 = vmatpush.msrb.mxu1 %v195_v20 }
  0x35   : > { %382 = vmatpush.msrb.mxu1 %v197_v26 }
  0x37   : > { %384 = vmatpush.msrb.mxu1 %v199_v31 }
  0x8a   : > { %v150_v44 = vpop.permute.xlu0 %149 }
  0x8b   : > { %vm151_vm1 = vcmp.eq.s32.totalorder %v147_v45, %v150_v44 }
  0x8c   : > { %v166_v46 = vpop.permute.xlu1 %165  ;;  %v473_v49 = vsel %vm151_vm1, 1.0, %v594_v48 }
  0x8d   : > { %vm167_vm2 = vcmp.eq.s32.totalorder %v147_v45, %v166_v46 }
  0x8e   : > { %v475_v51 = vsel %vm167_vm2, 1.0, %v594_v48 }
  0x93   : > { %v158_v47 = vpop.permute.xlu0 %157 }
  0x94   : > { %vm159_vm3 = vcmp.eq.s32.totalorder %v147_v45, %v158_v47 }
  0x95   : > { %v474_v50 = vsel %vm159_vm3, 1.0, %v594_v48 }
  0x96   : > { %v162_v52 = vadd.f32 %v474_v50, %v473_v49 }
  0x98   : > { %v170_v53 = vadd.f32 %v475_v51, %v162_v52 }
  0x9a   : > { %v173_v54 = vsel %vm171_vm4, %v170_v53, 0 }
  0x9b   : > { %v201_v55 = vand.u32 4294901760, %v173_v54 }
  0x9d   : > { %257 = vmatmul.f32.vlgmr.msra.gmra.mxu1 %v201_v55  ;;  %v202_v56 = vsub.f32 %v173_v54, %v201_v55 }
  0x9f   : > { %291 = vmatmul.f32.vlgmr.msra.gmra.mxu2 %v202_v56  ;;  %v203_v57 = vand.u32 4294901760, %v202_v56 }
  0xa1   : > { %320 = vmatmul.f32.vlgmr.msra.gmra.mxu3 %v203_v57  ;;  %v204_v58 = vsub.f32 %v202_v56, %v203_v57 }
  0xa3   : > { %v205_v59 = vand.u32 4294901760, %v204_v58 }
  0xa5   : > { %206 = vmatmul.f32.vlgmr.msra.gmra.mxu0 %v205_v59  ;;  %386 = vmatmul.f32.vlgmr.msrb.gmra.mxu1 %v201_v55 }
  0xad   : > { %359 = vmatmul.f32.vlgmr.msrb.gmra.mxu0 %v201_v55 }
 0x11a   : > { %v258_v60 = vpop.f32.mrf.mxu1 }
 0x122   : > { %v207_v61 = vpop.f32.mrf.mxu0  ;;  %v292_v63 = vpop.f32.mrf.mxu2 }
 0x123   : > { %v259_v62 = vadd.f32 %v258_v60, %v207_v61  ;;  %v387_v5 = vpop.f32.mrf.mxu1 }
 0x124   : > { %v321_v1 = vpop.f32.mrf.mxu3 }
 0x125   : > { %v293_v0 = vadd.f32 %v292_v63, %v259_v62 }
 0x127   : > { %v322_v2 = vadd.f32 %v321_v1, %v293_v0 }
 0x12a   : > { %v360_v3 = vpop.f32.mrf.mxu0 }
 0x12b   : > { %v361_v4 = vadd.f32 %v360_v3, %v322_v2 }
 0x12d   : > { %v388_v6 = vadd.f32 %v387_v5, %v361_v4 }
 0x12f   : > { %391 = vst.msk [vmem:[%s134_s25] sm:$0xff] %vm390_vm5, %v388_v6 }
 0x130   : > { %554 = shalt.err (!%p551_p3)
}
 0x131   : > { %480 = dma.vmem_to_hbm [thread:$0]  (%p648_p5), %s406_s26, 128, %s408_s27, %s393_s13  }
 0x132 PF: > { %p486_p4 = scmp.ge.s32.totalorder %s589_s12, 2  ;;  %s419_s7 = sand.u32 1, %s577_s9  }
 0x133   : > { %s420_s8 = scalar_lea.sflag [#allocation3], %s419_s7 }
 0x134   : > { %p483_p7 = pnand %p486_p4, %p652_p6 }
 0x136   : > { %p484_p8 = pneg %p483_p7 }
 0x138   : > { %572 = dma.done.wait (%p484_p8), %s420_s8, 128  }
 0x139   : > { %574 = vsyncadd (%p484_p8), %s420_s8, 4294967168  ;;  %p12_p9 = scmp.ge.s32.totalorder %s635_s15, 4   ;;  %s718_s9 = smov %s581_s10 }
 0x13a   : > { %s719_s10 = smov %s585_s11  ;;  %s720_s11 = smov %s646_s18 }
 0x13b   : > { %s721_s12 = smov %s635_s15  ;;  %14 = sbr.rel (!%p12_p9) target bundleno = 3 (0x3), region = 63 }
 0x140   :  { %426 = vsyncpa [#allocation3], 1 }
 0x141   :  { %428 = vsyncpa [#allocation3 + $0x1], 1 }

// kernel: tpu_custom_call.1
= control target key start
LH: loop header
LB: loop body
LE: loop exit
PB: predicated region body
PF: predicated region fallthrough
CT: control target
= control target key end

     0   :  { %7 = vsyncpa [#allocation3], 0  ;;  %s713_s0 = inlined_call_operand.vmem [shape: s32[16,3], index: 0, kind: input, shape index: {}]   ;;  %s714_s1 = inlined_call_operand.vmem [shape: f32[44,16], index: 1, kind: input, shape index: {}]   ;;  %s715_s2 = inlined_call_operand.hbm [shape: f32[16,16], index: 2, kind: output, shape index: {}]  }
   0x1   :  { %9 = vsyncpa [#allocation3 + $0x1], 0  ;;  %s610_s9 = smov 0   ;;  %s612_s10 = smov 0  }
   0x2   :  { %s614_s11 = smov 0   ;;  %s616_s12 = smov 0  }
   0x3 LB: > { %s631_s13 = sadd.s32 4294967295, %s589_s12   ;;  %s467_s14 = sadd.s32 4294967294, %s589_s12   ;;  %s589_s12 = sphi %s616_s12, %s721_s12   ;;  %s585_s11 = sphi %s614_s11, %s720_s11   ;;  %s581_s10 = sphi %s612_s10, %s719_s10   ;;  %s577_s9 = sphi %s610_s9, %s718_s9  }
   0x4   : > { %s635_s15 = sadd.s32 1, %s589_s12   ;;  %s69_s16 = sadd.s32 1, %s585_s11 }
   0x5   : > { %s66_s17 = ssub.s32 %s589_s12, %s635_s15  ;;  %p79_p0 = scmp.ne.s32.totalorder %s585_s11, %s581_s10 }
   0x6   : > { %p67_p1 = scmp.eq.s32.totalorder %s66_s17, 0  ;;  %p80_p2 = scmp.eq.s32.totalorder %s631_s13, 1 }
   0x7   : > { %p85_p3 = scmp.ne.s32.totalorder %s581_s10, %s577_s9  ;;  %p86_p4 = scmp.eq.s32.totalorder %s467_s14, 1 }
   0x8   : > { %s646_s18 = scalar_select %p67_p1, %s585_s11, %s69_s16  }
   0x9   : > { %p648_p5 = por %p80_p2, %p79_p0  ;;  %p652_p6 = por %p86_p4, %p85_p3 }
   0xa   : > { %p470_p7 = scmp.ge.s32.totalorder %s589_s12, 1  ;;  %p114_p8 = scmp.lt.s32.totalorder %s589_s12, 3 }
   0xc   : > { %p115_p9 = pnand %p470_p7, %p114_p8 }
   0xd   : > { %p135_p10 = scmp.lt.s32.totalorder (!%p115_p9), %s631_s13, 1  ;;  %s132_s16 = sand.u32 (!%p115_p9), 1, %s581_s10  }
   0xe   : > { %118 = sbr.rel (%p115_p9) target bundleno = 306 (0x132), region = 28  ;;  %s471_s17 = sshll.u32 (!%p115_p9), %s132_s16, 3 }
   0xf   : > { %s547_s4 = scalar_lea.hbm (!%p115_p9), %s715_s2, 16 }
  0x13   : > { %v591_v0 = vmov 0   ;;  %v592_v1 = vmov 2   ;;  %s136_s21 = scalar_select %p135_p10, %s631_s13, 1  ;;  %v593_v5 = vmov 1   ;;  %v145_v6 = vld [vmem:[%s714_s1 + $0x28] sm:$0xf]  ;;  %v146_v43 = vlaneseq }
  0x14   : > { %523 = vset.pattern.permute.xlu0 %v591_v0  ;;  %525 = vset.pattern.permute.xlu1 %v592_v1  ;;  %vm175_vm0 = vcmask 1043456   ;;  %v144_v9 = vld [vmem:[%s714_s1 + $0x20] sm:$0xff]  ;;  %v143_v12 = vld [vmem:[%s714_s1 + $0x18] sm:$0xff]  ;;  %v142_v16 = vld [vmem:[%s714_s1 + $0x10] sm:$0xff]  ;;  %v594_v48 = vmov 0.0   ;;  %vm171_vm4 = vcmask 359424  }
  0x15   : > { %s472_s22 = sshll.u32 %s136_s21, 3  ;;  %v177_v7 = vsel %vm175_vm0, %v145_v6, 0  ;;  %v191_v11 = vand.u32 4294901760, %v144_v9  ;;  %v193_v15 = vand.u32 4294901760, %v143_v12  ;;  %v195_v20 = vand.u32 4294901760, %v142_v16  ;;  %v141_v21 = vld [vmem:[%s714_s1 + $0x8] sm:$0xff] }
  0x16   : > { %s138_s25 = scalar_lea.vmem %s713_s0, %s472_s22  ;;  %v189_v8 = vand.u32 4294901760, %v177_v7  ;;  %v197_v26 = vand.u32 4294901760, %v141_v21  ;;  %v140_v27 = vld [vmem:[%s714_s1] sm:$0xff]  ;;  %v147_v45 = vand.u32 127, %v146_v43  ;;  %s477_s21 = sshll.u32 %s631_s13, 3  ;;  %vm390_vm5 = vcmask 130048  }
  0x17   : > { %v139_v2 = vld [vmem:[%s138_s25] sm:$0xff]  ;;  %v227_v14 = vsub.f32 %v144_v9, %v191_v11  ;;  %v233_v19 = vsub.f32 %v143_v12, %v193_v15  ;;  %v239_v25 = vsub.f32 %v142_v16, %v195_v20  ;;  %v199_v31 = vand.u32 4294901760, %v140_v27  ;;  %s403_s24 = scalar_lea.hbm %s715_s2, %s477_s21  ;;  %s134_s25 = scalar_lea.vmem [#allocation2], %s471_s17 }
  0x18   : > { %149 = vperm.xlu0 %523, %v139_v2   ;;  %v163_v3 = vadd.s32 32, %v139_v2  ;;  %v155_v4 = vadd.s32 20, %v139_v2  ;;  %v221_v10 = vsub.f32 %v177_v7, %v189_v8  ;;  %306 = vmatpush.msra.mxu3 %v189_v8  ;;  %v245_v32 = vsub.f32 %v141_v21, %v197_v26  ;;  %s405_s26 = sshll.u32 %s134_s25, 4  ;;  %s407_s27 = sshll.u32 %s403_s24, 4  ;;  %s406_s26 = int_to_ptr.vmem [resolvable:$true] %s405_s26  ;;  %s408_s27 = int_to_ptr.hbm [resolvable:$true] %s407_s27 }
  0x19   : > { %190 = vmatpush.msra.mxu0 %v189_v8  ;;  %v228_v18 = vand.u32 4294901760, %v227_v14  ;;  %v234_v24 = vand.u32 4294901760, %v233_v19  ;;  %v240_v30 = vand.u32 4294901760, %v239_v25  ;;  %v251_v35 = vsub.f32 %v140_v27, %v199_v31  ;;  %s393_s13 = scalar_lea.sflag [#allocation3], %s132_s16  ;;  %s541_s28 = sshra.s32 %s408_s27, 4  ;;  %s542_s28 = int_to_ptr.hbm [resolvable:$true] %s541_s28 }
  0x1a   : > { %165 = vperm.xlu1 %525, %v163_v3   ;;  %v222_v13 = vand.u32 4294901760, %v221_v10  ;;  %273 = vmatpush.msra.mxu2 %v221_v10  ;;  %v246_v36 = vand.u32 4294901760, %v245_v32  ;;  %s543_s29 = scalar_lea.hbm %s542_s28, 8  ;;  %p548_p0 = scmp.lt.s32.totalorder %s542_s28, %s715_s2 }
  0x1b   : > { %308 = vmatpush.msra.mxu3 %v191_v11  ;;  %192 = vmatpush.msra.mxu0 %v191_v11  ;;  %v229_v23 = vsub.f32 %v227_v14, %v228_v18  ;;  %v235_v29 = vsub.f32 %v233_v19, %v234_v24  ;;  %v241_v34 = vsub.f32 %v239_v25, %v240_v30  ;;  %v252_v38 = vand.u32 4294901760, %v251_v35  ;;  %p544_p11 = scmp.ne.s32.totalorder %s542_s28, %s543_s29  ;;  %p549_p1 = scmp.lt.s32.totalorder %s547_s4, %s543_s29 }
  0x1c   : > { %v223_v17 = vsub.f32 %v221_v10, %v222_v13  ;;  %276 = vmatpush.msra.mxu2 %v227_v14  ;;  %v247_v39 = vsub.f32 %v245_v32, %v246_v36 }
  0x1d   : > { %310 = vmatpush.msra.mxu3 %v193_v15  ;;  %194 = vmatpush.msra.mxu0 %v193_v15  ;;  %v230_v28 = vand.u32 4294901760, %v229_v23  ;;  %v236_v33 = vand.u32 4294901760, %v235_v29  ;;  %v242_v37 = vand.u32 4294901760, %v241_v34  ;;  %v253_v40 = vsub.f32 %v251_v35, %v252_v38  ;;  %p545_p12 = pnand %p544_p11, %p648_p5  ;;  %p550_p2 = por %p549_p1, %p548_p0 }
  0x1e   : > { %v224_v22 = vand.u32 4294901760, %v223_v17  ;;  %279 = vmatpush.msra.mxu2 %v233_v19  ;;  %v248_v41 = vand.u32 4294901760, %v247_v39 }
  0x1f   : > { %312 = vmatpush.msra.mxu3 %v195_v20  ;;  %196 = vmatpush.msra.mxu0 %v195_v20  ;;  %v254_v42 = vand.u32 4294901760, %v253_v40  ;;  %p546_p13 = pneg %p545_p12 }
  0x20   : > { %524 = vset.pattern.permute.xlu0 %v593_v5  ;;  %225 = vmatpush.msra.mxu1 %v224_v22 }
  0x21   : > { %157 = vperm.xlu0 %524, %v155_v4   ;;  %282 = vmatpush.msra.mxu2 %v239_v25  ;;  %p551_p3 = pnand %p550_p2, %p546_p13 }
  0x22   : > { %314 = vmatpush.msra.mxu3 %v197_v26  ;;  %198 = vmatpush.msra.mxu0 %v197_v26 }
  0x23   : > { %231 = vmatpush.msra.mxu1 %v230_v28  ;;  %285 = vmatpush.msra.mxu2 %v245_v32 }
  0x24   : > { %316 = vmatpush.msra.mxu3 %v199_v31  ;;  %200 = vmatpush.msra.mxu0 %v199_v31 }
  0x25   : > { %237 = vmatpush.msra.mxu1 %v236_v33  ;;  %288 = vmatpush.msra.mxu2 %v251_v35 }
  0x26   : > { %337 = vmatpush.msrb.mxu0 %v222_v13 }
  0x27   : > { %243 = vmatpush.msra.mxu1 %v242_v37 }
  0x28   : > { %341 = vmatpush.msrb.mxu0 %v228_v18 }
  0x29   : > { %526 = vset.pattern.permute.xlu0 %v592_v1  ;;  %249 = vmatpush.msra.mxu1 %v248_v41 }
  0x2a   : > { %345 = vmatpush.msrb.mxu0 %v234_v24 }
  0x2b   : > { %255 = vmatpush.msra.mxu1 %v254_v42 }
  0x2c   : > { %349 = vmatpush.msrb.mxu0 %v240_v30 }
  0x2d   : > { %374 = vmatpush.msrb.mxu1 %v189_v8 }
  0x2e   : > { %353 = vmatpush.msrb.mxu0 %v246_v36 }
  0x2f   : > { %376 = vmatpush.msrb.mxu1 %v191_v11 }
  0x30   : > { %357 = vmatpush.msrb.mxu0 %v252_v38 }
  0x31   : > { %378 = vmatpush.msrb.mxu1 %v193_v15 }
  0x33   : > { %380 = vmatpush.msrb.mxu1 %v195_v20 }
  0x35   : > { %382 = vmatpush.msrb.mxu1 %v197_v26 }
  0x37   : > { %384 = vmatpush.msrb.mxu1 %v199_v31 }
  0x8a   : > { %v150_v44 = vpop.permute.xlu0 %149 }
  0x8b   : > { %vm151_vm1 = vcmp.eq.s32.totalorder %v147_v45, %v150_v44 }
  0x8c   : > { %v166_v46 = vpop.permute.xlu1 %165  ;;  %v473_v49 = vsel %vm151_vm1, 1.0, %v594_v48 }
  0x8d   : > { %vm167_vm2 = vcmp.eq.s32.totalorder %v147_v45, %v166_v46 }
  0x8e   : > { %v475_v51 = vsel %vm167_vm2, 1.0, %v594_v48 }
  0x93   : > { %v158_v47 = vpop.permute.xlu0 %157 }
  0x94   : > { %vm159_vm3 = vcmp.eq.s32.totalorder %v147_v45, %v158_v47 }
  0x95   : > { %v474_v50 = vsel %vm159_vm3, 1.0, %v594_v48 }
  0x96   : > { %v162_v52 = vadd.f32 %v474_v50, %v473_v49 }
  0x98   : > { %v170_v53 = vadd.f32 %v475_v51, %v162_v52 }
  0x9a   : > { %v173_v54 = vsel %vm171_vm4, %v170_v53, 0 }
  0x9b   : > { %v201_v55 = vand.u32 4294901760, %v173_v54 }
  0x9d   : > { %257 = vmatmul.f32.vlgmr.msra.gmra.mxu1 %v201_v55  ;;  %v202_v56 = vsub.f32 %v173_v54, %v201_v55 }
  0x9f   : > { %291 = vmatmul.f32.vlgmr.msra.gmra.mxu2 %v202_v56  ;;  %v203_v57 = vand.u32 4294901760, %v202_v56 }
  0xa1   : > { %320 = vmatmul.f32.vlgmr.msra.gmra.mxu3 %v203_v57  ;;  %v204_v58 = vsub.f32 %v202_v56, %v203_v57 }
  0xa3   : > { %v205_v59 = vand.u32 4294901760, %v204_v58 }
  0xa5   : > { %206 = vmatmul.f32.vlgmr.msra.gmra.mxu0 %v205_v59  ;;  %386 = vmatmul.f32.vlgmr.msrb.gmra.mxu1 %v201_v55 }
  0xad   : > { %359 = vmatmul.f32.vlgmr.msrb.gmra.mxu0 %v201_v55 }
 0x11a   : > { %v258_v60 = vpop.f32.mrf.mxu1 }
 0x122   : > { %v207_v61 = vpop.f32.mrf.mxu0  ;;  %v292_v63 = vpop.f32.mrf.mxu2 }
 0x123   : > { %v259_v62 = vadd.f32 %v258_v60, %v207_v61  ;;  %v387_v5 = vpop.f32.mrf.mxu1 }
 0x124   : > { %v321_v1 = vpop.f32.mrf.mxu3 }
 0x125   : > { %v293_v0 = vadd.f32 %v292_v63, %v259_v62 }
 0x127   : > { %v322_v2 = vadd.f32 %v321_v1, %v293_v0 }
 0x12a   : > { %v360_v3 = vpop.f32.mrf.mxu0 }
 0x12b   : > { %v361_v4 = vadd.f32 %v360_v3, %v322_v2 }
 0x12d   : > { %v388_v6 = vadd.f32 %v387_v5, %v361_v4 }
 0x12f   : > { %391 = vst.msk [vmem:[%s134_s25] sm:$0xff] %vm390_vm5, %v388_v6 }
 0x130   : > { %554 = shalt.err (!%p551_p3)
}
 0x131   : > { %480 = dma.vmem_to_hbm [thread:$0]  (%p648_p5), %s406_s26, 128, %s408_s27, %s393_s13  }
 0x132 PF: > { %p486_p4 = scmp.ge.s32.totalorder %s589_s12, 2  ;;  %s419_s7 = sand.u32 1, %s577_s9  }
 0x133   : > { %s420_s8 = scalar_lea.sflag [#allocation3], %s419_s7 }
 0x134   : > { %p483_p7 = pnand %p486_p4, %p652_p6 }
 0x136   : > { %p484_p8 = pneg %p483_p7 }
 0x138   : > { %572 = dma.done.wait (%p484_p8), %s420_s8, 128  }
 0x139   : > { %574 = vsyncadd (%p484_p8), %s420_s8, 4294967168  ;;  %p12_p9 = scmp.ge.s32.totalorder %s635_s15, 4   ;;  %s718_s9 = smov %s581_s10 }
 0x13a   : > { %s719_s10 = smov %s585_s11  ;;  %s720_s11 = smov %s646_s18 }
 0x13b   : > { %s721_s12 = smov %s635_s15  ;;  %14 = sbr.rel (!%p12_p9) target bundleno = 3 (0x3), region = 63 }
 0x140   :  { %426 = vsyncpa [#allocation3], 1 }
 0x141   :  { %428 = vsyncpa [#allocation3 + $0x1], 1 }

</bundles_post_ra>
